<compile_context>
chip_gen: v7x
topology: tpu7x:2x2x1
jax: 0.10.0
libtpu: 0.0.40
codegen_flags: <defaults>
</compile_context>

<pallas_src>
import functools
import math

import jax
import jax.numpy as jnp
from jax.experimental import pallas as pl
from jax.experimental.pallas import tpu as pltpu


# ----------------------------------------------------------------------------- kernels
def _layernorm_kernel(x_ref, gamma_ref, beta_ref, o_ref, *, eps):
    """Generic path: one logical row per sublane row. x_ref: (T, D)."""
    x = x_ref[...].astype(jnp.float32)
    mean = jnp.mean(x, axis=-1, keepdims=True)
    centered = x - mean
    # unbiased=False -> divide by D (population variance)
    var = jnp.mean(centered * centered, axis=-1, keepdims=True)
    inv_std = jax.lax.rsqrt(var + eps)                       # EUP rsqrt (free slot)
    out = gamma_ref[...] * (centered * inv_std) + beta_ref[...]
    o_ref[...] = out.astype(o_ref.dtype)


def _layernorm_packed_kernel(x_ref, gamma_ref, beta_ref, avg_ref, o_ref, *, eps):
    """Lane-dense path: k logical rows packed per (k*D)-lane row.

    avg_ref is a (k*D, k*D) block-diagonal averaging matrix A with
    A[m, j] = 1/D if m//D == j//D else 0, so `x @ A` broadcasts each logical
    row's mean across its own D-lane segment.  The two small matmuls run on the
    MXU, which is idle in this HBM-bound kernel.
    """
    x = x_ref[...].astype(jnp.float32)                       # (T, k*D), lane-dense
    A = avg_ref[...]                                         # (k*D, k*D), resident
    mean_full = jnp.dot(x, A, preferred_element_type=jnp.float32)
    centered = x - mean_full
    var_full = jnp.dot(centered * centered, A, preferred_element_type=jnp.float32)
    inv_std = jax.lax.rsqrt(var_full + eps)
    out = gamma_ref[...] * (centered * inv_std) + beta_ref[...]
    o_ref[...] = out.astype(o_ref.dtype)


# ----------------------------------------------------------------------------- helpers
def _round_up(x, m):
    return ((x + m - 1) // m) * m


def _device_info():
    """(vmem_capacity_bytes, num_tensorcores) with conservative fallbacks."""
    vmem_bytes = 64 << 20          # v7x-safe default if the query fails
    num_tc = 1
    try:
        info = pltpu.get_tpu_info()
        vmem_bytes = int(getattr(info, "vmem_capacity_bytes", vmem_bytes))
    except Exception:
        pass
    try:
        kind = jax.devices()[0].device_kind.lower()
        if "7" in kind:            # v7x: 2 TensorCores per chip
            num_tc = 2
    except Exception:
        pass
    return vmem_bytes, num_tc


# ----------------------------------------------------------------------------- wrapper
def layer_norm(x, gamma, beta, eps=1e-12, target_block_bytes=None, allow_packing=True):
    """x: (..., D); gamma, beta: (D,). Returns array of same shape/dtype as x."""
    orig_shape = x.shape
    D = orig_shape[-1]
    x2 = x.reshape(-1, D)
    R = x2.shape[0]

    vmem_bytes, num_tc = _device_info()
    # Scoped-VMEM budget: ~75% of physical -> 48 MiB on v7x, 96 MiB on v5e/v6e.
    vmem_budget = int(vmem_bytes * 3 // 4)
    if target_block_bytes is None:
        # Bigger tiles on 128-MiB parts, smaller on v7x (64 MiB per TC).
        target_block_bytes = (6 << 20) if vmem_bytes >= (96 << 20) else (3 << 20)

    gamma_f32 = gamma.reshape(1, D).astype(jnp.float32)
    beta_f32 = beta.reshape(1, D).astype(jnp.float32)

    # ---- layout choice: lane-dense packing when D is not a multiple of 128 ----
    packed = False
    extra_inputs = []
    extra_specs = []
    if allow_packing and D % 128 != 0:
        k = 128 // math.gcd(D, 128)         # rows per packed row; k*D = lcm(D,128)
        kd = k * D
        # Only pack when the packed width stays modest (resident A <= 1 MiB) and
        # the row count reshapes for free (no wrapper-side pad copy).
        if k > 1 and kd <= 512 and R % k == 0:
            packed = True
            rows, width = R // k, kd
            x_in = x2.reshape(rows, width)                   # contiguous: free view
            gamma_in = jnp.tile(gamma_f32, (1, k))           # (1, k*D)
            beta_in = jnp.tile(beta_f32, (1, k))
            seg = jnp.arange(width, dtype=jnp.int32) // D
            avg = (seg[:, None] == seg[None, :]).astype(jnp.float32) / float(D)
            extra_inputs = [avg]
            extra_specs = [pl.BlockSpec((width, width), lambda i: (0, 0))]
            kernel = functools.partial(_layernorm_packed_kernel, eps=eps)
    if not packed:
        rows, width = R, D
        x_in = x2
        gamma_in, beta_in = gamma_f32, beta_f32
        kernel = functools.partial(_layernorm_kernel, eps=eps)

    # ---- tile sizing under the per-generation VMEM budget ----
    itemsize = jnp.dtype(x.dtype).itemsize
    sublane = 8 if itemsize >= 4 else (16 if itemsize == 2 else 32)
    bytes_per_row = max(width * itemsize, 1)
    # Per-row working set: double-buffered in + out blocks (x dtype) plus ~3
    # f32-block temporaries live in the kernel (x_f32, centered, affine out).
    ws_per_row = 4 * width * itemsize + 3 * width * 4
    # Resident arrays: gamma/beta (+ averaging matrix on the packed path).
    fixed_ws = 3 * width * 4 + (width * width * 4 if packed else 0)

    if rows <= sublane:
        tile_rows = rows                                      # full extent, 1 step
    else:
        cap = (rows // sublane) * sublane                     # largest aligned block <= rows
        max_rows_vmem = max((vmem_budget - fixed_ws) // ws_per_row, sublane)
        tile_rows = max(target_block_bytes // bytes_per_row, sublane)
        tile_rows = min(tile_rows, max_rows_vmem)
        tile_rows = max((tile_rows // sublane) * sublane, sublane)
        tile_rows = int(min(tile_rows, cap))

        # Balance the "parallel" row axis across the two TensorCores on v7x.
        if num_tc >= 2:
            steps = pl.cdiv(rows, tile_rows)
            if steps == 1:
                tile_rows = int(min(_round_up(pl.cdiv(rows, 2), sublane), cap))
            elif steps % 2 == 1:
                t = int(min(_round_up(pl.cdiv(rows, steps + 1), sublane), cap))
                if pl.cdiv(rows, t) % 2 == 0:
                    tile_rows = t

    grid = (pl.cdiv(rows, tile_rows),)

    # Scoped VMEM sized from the actual working set, clamped to the budget.
    vmem_limit = int(tile_rows * ws_per_row + fixed_ws + (1 << 20))
    vmem_limit = int(min(max(vmem_limit, 16 << 20), vmem_budget))

    out = pl.pallas_call(
        kernel,
        out_shape=jax.ShapeDtypeStruct((rows, width), x.dtype),
        grid_spec=pltpu.PrefetchScalarGridSpec(
            num_scalar_prefetch=0,
            grid=grid,
            in_specs=[
                pl.BlockSpec((tile_rows, width), lambda i: (i, 0)),
                # Constant-index blocks: fetched once, resident across the grid.
                pl.BlockSpec((1, width), lambda i: (0, 0)),
                pl.BlockSpec((1, width), lambda i: (0, 0)),
            ] + extra_specs,
            out_specs=pl.BlockSpec((tile_rows, width), lambda i: (i, 0)),
        ),
        compiler_params=pltpu.CompilerParams(
            dimension_semantics=("parallel",),
            vmem_limit_bytes=vmem_limit,
        ),
    )(x_in, gamma_in, beta_in, *extra_inputs)

    return out.reshape(orig_shape)


# ----------------------------------------------------------------------------- test
if __name__ == "__main__":
    key = jax.random.PRNGKey(0)
    batch, seq, embed_dim = 2, 8, 32
    kx, kg, kb = jax.random.split(key, 3)
    x = jax.random.normal(kx, (batch, seq, embed_dim), dtype=jnp.float32)

    eps = 1e-12  # module default in the spec (torch.nn.LayerNorm default would be 1e-5)

    def ref_ln(x, g, b):
        mean = jnp.mean(x, axis=-1, keepdims=True)
        var = jnp.mean((x - mean) ** 2, axis=-1, keepdims=True)
        return g * ((x - mean) / jnp.sqrt(var + eps)) + b

    # 1) Parameters exactly as initialized by the module (ones / zeros).
    gamma = jnp.ones((embed_dim,), dtype=jnp.float32)
    beta = jnp.zeros((embed_dim,), dtype=jnp.float32)
    out = jax.block_until_ready(layer_norm(x, gamma, beta, eps=eps))
    assert jnp.allclose(out, ref_ln(x, gamma, beta), atol=1e-5, rtol=1e-5), \
        "mismatch vs reference (unit affine, packed path)"

    # 2) Non-trivial affine parameters to exercise the gamma/beta path.
    gamma2 = jax.random.normal(kg, (embed_dim,), dtype=jnp.float32)
    beta2 = jax.random.normal(kb, (embed_dim,), dtype=jnp.float32)
    out2 = jax.block_until_ready(layer_norm(x, gamma2, beta2, eps=eps))
    assert jnp.allclose(out2, ref_ln(x, gamma2, beta2), atol=1e-5, rtol=1e-5), \
        "mismatch vs reference (random affine, packed path)"

    # 3) Generic (non-packed) path on the same data.
    out3 = jax.block_until_ready(
        layer_norm(x, gamma2, beta2, eps=eps, allow_packing=False))
    assert jnp.allclose(out3, ref_ln(x, gamma2, beta2), atol=1e-5, rtol=1e-5), \
        "mismatch vs reference (generic path)"

    # 4) Row count not divisible by the packing factor -> automatic generic fallback.
    x_odd = jax.random.normal(kx, (3, embed_dim), dtype=jnp.float32)
    out4 = jax.block_until_ready(layer_norm(x_odd, gamma2, beta2, eps=eps))
    assert jnp.allclose(out4, ref_ln(x_odd, gamma2, beta2), atol=1e-5, rtol=1e-5), \
        "mismatch vs reference (odd row count fallback)"

    print("KERNEL_OK")
</pallas_src>

<mosaic_0001>
module attributes {stable_mosaic.version = 11 : i64} {
  func.func @_layernorm_packed_kernel(%arg0: i32, %arg1: memref<4x128xf32, #tpu.memory_space<vmem>>, %arg2: memref<1x128xf32, #tpu.memory_space<vmem>>, %arg3: memref<1x128xf32, #tpu.memory_space<vmem>>, %arg4: memref<128x128xf32, #tpu.memory_space<vmem>>, %arg5: memref<4x128xf32, #tpu.memory_space<vmem>>) attributes {dimension_semantics = [#tpu.dimension_semantics<parallel>], iteration_bounds = array<i64: 1>, scalar_prefetch = 0 : i64, scratch_operands = 0 : i64, tpu.core_type = #tpu.core_type<tc>, window_params = [{transform_indices = @transform_0, window_bounds = array<i64: 4, 128>}, {pipeline_mode = #tpu.pipeline_mode<synchronous>, transform_indices = @transform_1, window_bounds = array<i64: 1, 128>}, {pipeline_mode = #tpu.pipeline_mode<synchronous>, transform_indices = @transform_2, window_bounds = array<i64: 1, 128>}, {pipeline_mode = #tpu.pipeline_mode<synchronous>, transform_indices = @transform_3, window_bounds = array<i64: 128, 128>}, {transform_indices = @transform_4, window_bounds = array<i64: 4, 128>}]} {
    %c0 = arith.constant 0 : index
    %c0_0 = arith.constant 0 : index
    %0 = vector.load %arg1[%c0, %c0_0] : memref<4x128xf32, #tpu.memory_space<vmem>>, vector<4x128xf32>
    %c0_1 = arith.constant 0 : index
    %c0_2 = arith.constant 0 : index
    %1 = vector.load %arg4[%c0_1, %c0_2] : memref<128x128xf32, #tpu.memory_space<vmem>>, vector<128x128xf32>
    %cst = arith.constant dense<0.000000e+00> : vector<4x128xf32>
    %2 = tpu.matmul %0, %1, %cst {dimension_numbers = #tpu.dot_dimension_numbers<[1], [0], [0], [1], [0, 0, 1, 1], [], []>} : vector<4x128xf32>, vector<128x128xf32>, vector<4x128xf32> -> vector<4x128xf32>
    %3 = arith.subf %0, %2 : vector<4x128xf32>
    %4 = arith.mulf %3, %3 : vector<4x128xf32>
    %cst_3 = arith.constant dense<0.000000e+00> : vector<4x128xf32>
    %5 = tpu.matmul %4, %1, %cst_3 {dimension_numbers = #tpu.dot_dimension_numbers<[1], [0], [0], [1], [0, 0, 1, 1], [], []>} : vector<4x128xf32>, vector<128x128xf32>, vector<4x128xf32> -> vector<4x128xf32>
    %cst_4 = arith.constant 9.99999996E-13 : f32
    %6 = vector.broadcast %cst_4 : f32 to vector<4x128xf32>
    %7 = arith.addf %5, %6 : vector<4x128xf32>
    %8 = math.rsqrt %7 : vector<4x128xf32>
    %c0_5 = arith.constant 0 : index
    %c0_6 = arith.constant 0 : index
    %9 = vector.load %arg2[%c0_5, %c0_6] : memref<1x128xf32, #tpu.memory_space<vmem>>, vector<1x128xf32>
    %10 = arith.mulf %3, %8 : vector<4x128xf32>
    %11 = vector.broadcast %9 : vector<1x128xf32> to vector<4x128xf32>
    %12 = arith.mulf %11, %10 : vector<4x128xf32>
    %c0_7 = arith.constant 0 : index
    %c0_8 = arith.constant 0 : index
    %13 = vector.load %arg3[%c0_7, %c0_8] : memref<1x128xf32, #tpu.memory_space<vmem>>, vector<1x128xf32>
    %14 = vector.broadcast %13 : vector<1x128xf32> to vector<4x128xf32>
    %15 = arith.addf %12, %14 : vector<4x128xf32>
    %c0_9 = arith.constant 0 : index
    %c0_10 = arith.constant 0 : index
    %16 = vector.load %arg5[%c0_9, %c0_10] : memref<4x128xf32, #tpu.memory_space<vmem>>, vector<4x128xf32>
    tpu.vector_store %arg5[%c0_9, %c0_10], %15 {strides = array<i32>} : memref<4x128xf32, #tpu.memory_space<vmem>>, vector<4x128xf32>,
    return
  }
  func.func @transform_0(%arg0: i32) -> (i32, i32) {
    %c0_i32 = arith.constant 0 : i32
    %c0_i32_0 = arith.constant 0 : i32
    return %arg0, %c0_i32 : i32, i32
  }
  func.func @transform_1(%arg0: i32) -> (i32, i32) {
    %c0_i32 = arith.constant 0 : i32
    %c0_i32_0 = arith.constant 0 : i32
    %c0_i32_1 = arith.constant 0 : i32
    return %c0_i32, %c0_i32_0 : i32, i32
  }
  func.func @transform_2(%arg0: i32) -> (i32, i32) {
    %c0_i32 = arith.constant 0 : i32
    %c0_i32_0 = arith.constant 0 : i32
    %c0_i32_1 = arith.constant 0 : i32
    return %c0_i32, %c0_i32_0 : i32, i32
  }
  func.func @transform_3(%arg0: i32) -> (i32, i32) {
    %c0_i32 = arith.constant 0 : i32
    %c0_i32_0 = arith.constant 0 : i32
    %c0_i32_1 = arith.constant 0 : i32
    return %c0_i32, %c0_i32_0 : i32, i32
  }
  func.func @transform_4(%arg0: i32) -> (i32, i32) {
    %c0_i32 = arith.constant 0 : i32
    %c0_i32_0 = arith.constant 0 : i32
    return %arg0, %c0_i32 : i32, i32
  }
}

</mosaic_0001>

<bundles_post_ra>
// kernel: tpu_custom_call.1
= control target key start
LH: loop header
LB: loop body
LE: loop exit
PB: predicated region body
PF: predicated region fallthrough
CT: control target
= control target key end

     0   :  { %9 = vsyncpa [#allocation3], 0  ;;  %s556_s0 = inlined_call_operand.hbm [shape: f32[4,128], index: 0, kind: input, shape index: {}]   ;;  %s557_s1 = inlined_call_operand.vmem [shape: f32[1,128], index: 1, kind: input, shape index: {}]   ;;  %s558_s2 = inlined_call_operand.vmem [shape: f32[1,128], index: 2, kind: input, shape index: {}]   ;;  %s559_s3 = inlined_call_operand.hbm [shape: f32[128,128], index: 3, kind: input, shape index: {}]   ;;  %s560_s4 = inlined_call_operand.hbm [shape: f32[4,128], index: 4, kind: output, shape index: {}]  }
   0x1   :  { %10 = vsyncpa [#allocation6], 0 }
   0x2   :  { %11 = vsyncpa [#allocation4], 0  ;;  %s474_s15 = smov [#allocation2]   ;;  %s475_s17 = smov [#allocation5]  }
   0x3   :  { %s18_s16 = sshll.u32 %s474_s15, 4  ;;  %s31_s18 = sshll.u32 %s475_s17, 4  ;;  %s19_s16 = int_to_ptr.vmem [resolvable:$true] %s18_s16  ;;  %s507_s18 = int_to_ptr.vmem [resolvable:$true] %s31_s18 }
   0x4   :  { %s402_s21 = scalar_lea.hbm %s556_s0, 64 }
   0x5   :  { %p403_p0 = scmp.ne.s32.totalorder %s556_s0, %s402_s21  ;;  %p406_p1 = scmp.lt.u32.totalorder %s402_s21, %s556_s0 }
   0x7   :  { %p408_p2 = pnand %p406_p1, %p403_p0 }
   0x9   :  { %411 = shalt.err (!%p408_p2)
}
   0xa   :  { %s412_s26 = scalar_lea.vmem %s19_s16, 64  ;;  %p417_p4 = scmp.lt.s32.totalorder %s19_s16, %s19_s16 }
   0xb   :  { %p413_p3 = scmp.ne.s32.totalorder %s19_s16, %s412_s26  ;;  %p418_p5 = scmp.lt.s32.totalorder %s412_s26, %s412_s26 }
   0xd   :  { %p419_p6 = por %p418_p5, %p417_p4 }
   0xf   :  { %p420_p7 = pnand %p419_p6, %p413_p3 }
  0x11   :  { %423 = shalt.err (!%p420_p7)
}
  0x12   :  { %21 = dma.hbm_to_vmem [thread:$0]  %s556_s0, 64, %s19_s16, [#allocation3]  }
  0x13   :  { %s424_s5 = scalar_lea.hbm %s559_s3, 2048 }
  0x14   :  { %p425_p8 = scmp.ne.s32.totalorder %s559_s3, %s424_s5  ;;  %p428_p9 = scmp.lt.u32.totalorder %s424_s5, %s559_s3 }
  0x16   :  { %p430_p10 = pnand %p428_p9, %p425_p8 }
  0x18   :  { %433 = shalt.err (!%p430_p10)
}
  0x19   :  { %s434_s10 = scalar_lea.vmem %s507_s18, 2048  ;;  %p439_p12 = scmp.lt.s32.totalorder %s507_s18, %s507_s18 }
  0x1a   :  { %p435_p11 = scmp.ne.s32.totalorder %s507_s18, %s434_s10  ;;  %p440_p13 = scmp.lt.s32.totalorder %s434_s10, %s434_s10 }
  0x1c   :  { %p441_p0 = por %p440_p13, %p439_p12 }
  0x1e   :  { %p442_p1 = pnand %p441_p0, %p435_p11 }
  0x20   :  { %445 = shalt.err (!%p442_p1)
}
  0x21   :  { %s476_s0 = smov 128   ;;  %s477_s11 = smov 8  }
  0x22   :  { %37 = dma.hbm_to_vmem [thread:$0]  %s559_s3, 2048, %s507_s18, [#allocation6], %s476_s0, %s476_s0, %s477_s11  }
  0x23   :  { %468 = dma.done.wait [#allocation3], 64  }
  0x24   :  { %469 = vsyncadd [#allocation3], 4294967232 }
  0x25   :  { %470 = dma.done.wait [#allocation6], 2048  }
  0x26   :  { %471 = vsyncadd [#allocation6], 4294965248  ;;  %v478_v0 = vmov 0.0|0.0   ;;  %vm479_vm0 = vmmov 0   ;;  %v480_v1 = vmov 0.0   ;;  %v45_v2 = vld [vmem:[#allocation5] sm:$0xff] }
  0x27   :  { %344 = vmatprep.subr.bf16.mxu0 %v478_v0  ;;  %306 = vmatprep.mubr.msk.f32.mxu0 %vm479_vm0, %v480_v1  ;;  %v46_v3 = vld [vmem:[#allocation5 + $0x8] sm:$0xff]  ;;  %v47_v4 = vld [vmem:[#allocation5 + $0x10] sm:$0xff]  ;;  %v48_v6 = vld [vmem:[#allocation5 + $0x18] sm:$0xff]  ;;  %s481_s17 = smov [#allocation7]  }
  0x28   :  { %368 = vmatprep.subr.bf16.mxu1 %v478_v0  ;;  %341 = vmatprep.mubr.msk.f32.mxu1 %vm479_vm0, %v480_v1  ;;  %v345_v5 = vpack.c.bf16 %v46_v3, %v45_v2  ;;  %v348_v7 = vpack.c.bf16 %v48_v6, %v47_v4  ;;  %v49_v8 = vld [vmem:[#allocation5 + $0x20] sm:$0xff]  ;;  %v50_v9 = vld [vmem:[#allocation5 + $0x28] sm:$0xff]  ;;  %v51_v11 = vld [vmem:[#allocation5 + $0x30] sm:$0xff]  ;;  %s228_s18 = sshll.u32 %s481_s17, 4  ;;  %s229_s18 = int_to_ptr.vmem [resolvable:$true] %s228_s18 }
  0x29   :  { %v351_v10 = vpack.c.bf16 %v50_v9, %v49_v8  ;;  %v52_v12 = vld [vmem:[#allocation5 + $0x38] sm:$0xff]  ;;  %v53_v14 = vld [vmem:[#allocation5 + $0x40] sm:$0xff]  ;;  %v54_v15 = vld [vmem:[#allocation5 + $0x48] sm:$0xff]  ;;  %s446_s19 = scalar_lea.vmem %s229_s18, 64  ;;  %p451_p3 = scmp.lt.s32.totalorder %s229_s18, %s229_s18 }
  0x2a   :  { %346 = vmatpush3.bf16.msra.mxu0 %v345_v5  ;;  %370 = vmatpush3.bf16.msra.mxu1 %v345_v5  ;;  %v354_v13 = vpack.c.bf16 %v52_v12, %v51_v11  ;;  %v357_v16 = vpack.c.bf16 %v54_v15, %v53_v14  ;;  %v55_v17 = vld [vmem:[#allocation5 + $0x50] sm:$0xff]  ;;  %v56_v18 = vld [vmem:[#allocation5 + $0x58] sm:$0xff]  ;;  %v57_v20 = vld [vmem:[#allocation5 + $0x60] sm:$0xff]  ;;  %p447_p2 = scmp.ne.s32.totalorder %s229_s18, %s446_s19  ;;  %p452_p4 = scmp.lt.s32.totalorder %s446_s19, %s446_s19 }
  0x2b   :  { %347 = vmatprep.subr.bf16.mxu0 %v478_v0  ;;  %371 = vmatprep.subr.bf16.mxu1 %v478_v0  ;;  %v360_v19 = vpack.c.bf16 %v56_v18, %v55_v17  ;;  %v58_v21 = vld [vmem:[#allocation5 + $0x68] sm:$0xff]  ;;  %v59_v23 = vld [vmem:[#allocation5 + $0x70] sm:$0xff]  ;;  %v60_v24 = vld [vmem:[#allocation5 + $0x78] sm:$0xff] }
  0x2c   :  { %v363_v22 = vpack.c.bf16 %v58_v21, %v57_v20  ;;  %v366_v25 = vpack.c.bf16 %v60_v24, %v59_v23  ;;  %v44_v26 = vld [vmem:[#allocation2] sm:$0xf]  ;;  %p453_p5 = por %p452_p4, %p451_p3 }
  0x2d   :  { %v238_v35 = vld [vmem:[%s557_s1] ss:$0 sm:$0xff] }
  0x2e   :  { %349 = vmatpush3.bf16.msra.mxu0 %v348_v7  ;;  %373 = vmatpush3.bf16.msra.mxu1 %v348_v7  ;;  %v239_v37 = vld [vmem:[%s558_s2] ss:$0 sm:$0xff]  ;;  %p454_p6 = pnand %p453_p5, %p447_p2 }
  0x2f   :  { %350 = vmatprep.subr.bf16.mxu0 %v478_v0  ;;  %374 = vmatprep.subr.bf16.mxu1 %v478_v0 }
  0x32   :  { %352 = vmatpush3.bf16.msra.mxu0 %v351_v10  ;;  %376 = vmatpush3.bf16.msra.mxu1 %v351_v10 }
  0x33   :  { %353 = vmatprep.subr.bf16.mxu0 %v478_v0  ;;  %377 = vmatprep.subr.bf16.mxu1 %v478_v0 }
  0x36   :  { %355 = vmatpush3.bf16.msra.mxu0 %v354_v13  ;;  %379 = vmatpush3.bf16.msra.mxu1 %v354_v13 }
  0x37   :  { %356 = vmatprep.subr.bf16.mxu0 %v478_v0  ;;  %380 = vmatprep.subr.bf16.mxu1 %v478_v0 }
  0x3a   :  { %358 = vmatpush3.bf16.msra.mxu0 %v357_v16  ;;  %382 = vmatpush3.bf16.msra.mxu1 %v357_v16 }
  0x3b   :  { %359 = vmatprep.subr.bf16.mxu0 %v478_v0  ;;  %383 = vmatprep.subr.bf16.mxu1 %v478_v0 }
  0x3e   :  { %361 = vmatpush3.bf16.msra.mxu0 %v360_v19  ;;  %385 = vmatpush3.bf16.msra.mxu1 %v360_v19 }
  0x3f   :  { %362 = vmatprep.subr.bf16.mxu0 %v478_v0  ;;  %386 = vmatprep.subr.bf16.mxu1 %v478_v0 }
  0x42   :  { %364 = vmatpush3.bf16.msra.mxu0 %v363_v22  ;;  %388 = vmatpush3.bf16.msra.mxu1 %v363_v22 }
  0x43   :  { %365 = vmatprep.subr.bf16.mxu0 %v478_v0  ;;  %389 = vmatprep.subr.bf16.mxu1 %v478_v0 }
  0x46   :  { %367 = vmatpush3.bf16.msra.mxu0 %v366_v25  ;;  %391 = vmatpush3.bf16.msra.mxu1 %v366_v25 }
  0x49   :  { %307 = vmatmul.mubr.f32.vlgmr.msra.gmra.mrb[0].mxu0 %v44_v26 }
 0x11c   :  { %v127_v27 = vpop.f32.mrb[0].mxu0 }
 0x11d   :  { %v131_v28 = vsub.f32 %v44_v26, %v127_v27  ;;  %v308_v29 = vpop.f32.mrb[1].mxu0 }
 0x11f   :  { %v132_v30 = vmul.f32 %v131_v28, %v131_v28 }
 0x121   :  { %342 = vmatmul.mubr.f32.vlgmr.msra.gmra.mrb[0].mxu1 %v132_v30 }
 0x1f4   :  { %v199_v31 = vpop.f32.mrb[0].mxu1 }
 0x1f5   :  { %v200_v32 = vadd.f32 1e-12, %v199_v31  ;;  %v343_v33 = vpop.f32.mrb[1].mxu1 }
 0x1f7   :  { %400 = vrsqrt.f32 %v200_v32 }
 0x201   :  { %v401_v34 = vpop.eup %400 }
 0x202   :  { %v205_v36 = vmul.f32 %v401_v34, %v131_v28 }
 0x204   :  { %v212_v38 = vmul.f32 %v238_v35, %v205_v36 }
 0x206   :  { %v220_v39 = vadd.f32 %v239_v37, %v212_v38 }
 0x208   :  { %221 = vst [vmem:[#allocation7] sm:$0xf] %v220_v39 }
 0x209   :  { %457 = shalt.err (!%p454_p6)
}
 0x20a   :  { %s458_s21 = scalar_lea.hbm %s560_s4, 64 }
 0x20b   :  { %p459_p7 = scmp.ne.s32.totalorder %s560_s4, %s458_s21  ;;  %p462_p8 = scmp.lt.u32.totalorder %s458_s21, %s560_s4 }
 0x20d   :  { %p464_p9 = pnand %p462_p8, %p459_p7 }
 0x20f   :  { %467 = shalt.err (!%p464_p9)
}
 0x210   :  { %231 = dma.vmem_to_hbm [thread:$0]  %s229_s18, 64, %s560_s4, [#allocation4]  }
 0x211   :  { %472 = dma.done.wait [#allocation4], 64  }
 0x212   :  { %473 = vsyncadd [#allocation4], 4294967232 }
 0x213   :  { %235 = vsyncpa [#allocation3], 1 }
 0x214   :  { %236 = vsyncpa [#allocation6], 1 }
 0x215   :  { %237 = vsyncpa [#allocation4], 1 }

</bundles_post_ra>
